<compile_context>
chip_gen: v7x
topology: tpu7x:2x2x1
jax: 0.10.0
libtpu: 0.0.40
codegen_flags: <defaults>
</compile_context>

<pallas_src>
import jax
import jax.numpy as jnp
from jax.experimental import pallas as pl
from jax.experimental.pallas import tpu as pltpu  # noqa: F401  (TPU backend)


def _index_select_kernel(idx_ref, x_ref, o_ref):
    # idx_ref: VMEM int32 [Np, 1]   (padded index column)
    # x_ref:   VMEM f32   [A, L, C] (entire input, resident)
    # o_ref:   VMEM f32   [A, Np, C]
    A, L, C = x_ref.shape
    n_pad = o_ref.shape[1]

    # Vectorized clamp + one-hot build: a single vreg compare against a lane
    # iota.  No per-index scalar reads, no scalar->vreg broadcast chain.
    # TODO(synk): torch.index_select raises on out-of-range indices; here they
    # are clamped (jnp.take clip semantics) since a kernel cannot raise.
    idx = jnp.clip(idx_ref[...], 0, L - 1)                              # (Np, 1)
    iota_l = jax.lax.broadcasted_iota(jnp.int32, (n_pad, L), 1)         # (Np, L)
    onehot = (idx == iota_l).astype(jnp.float32)                        # (Np, L)

    # Single batched contraction over L (batch dim = A):
    #   out[a, n, c] = sum_l onehot[n, l] * x[a, l, c]
    # Result lands directly in the (A, Np, C) output layout -> one dense store.
    onehot_b = jnp.broadcast_to(onehot[None], (A, n_pad, L))            # (A, Np, L)
    gathered = jax.lax.dot_general(
        onehot_b,
        x_ref[...],
        dimension_numbers=(((2,), (1,)), ((0,), (0,))),
        preferred_element_type=jnp.float32,
        precision=jax.lax.Precision.HIGHEST,   # exact f32; no bf16 downcast (v5e-safe)
    )
    o_ref[...] = gathered.astype(o_ref.dtype)


def index_select_dim1(x, indices):
    """Equivalent of torch.index_select(x, 1, indices) for 3-D float x."""
    A, L, C = x.shape
    n = indices.shape[0]

    # Empty-indices fast path: jnp.stack/kernel would be ill-defined for N=0.
    if n == 0:
        return jnp.zeros((A, 0, C), x.dtype)

    # Bucket the dynamic length N to the next multiple of 8 so distinct
    # runtime lengths inside a bucket share one compiled kernel; pad with a
    # valid index (0) and slice the result back to N.
    n_pad = 8 * pl.cdiv(n, 8)
    idx = indices.astype(jnp.int32)                 # 32-bit indices on TPU
    if n_pad != n:
        idx = jnp.pad(idx, (0, n_pad - n))          # pads with index 0
    idx2d = idx.reshape(n_pad, 1)                   # sublane-major index column

    out = pl.pallas_call(
        _index_select_kernel,
        out_shape=jax.ShapeDtypeStruct((A, n_pad, C), x.dtype),
        in_specs=[
            pl.BlockSpec((n_pad, 1), lambda: (0, 0)),       # indices, full block
            pl.BlockSpec((A, L, C), lambda: (0, 0, 0)),     # whole input resident
        ],
        out_specs=pl.BlockSpec((A, n_pad, C), lambda: (0, 0, 0)),
    )(idx2d, x)

    return out[:, :n, :] if n_pad != n else out


if __name__ == "__main__":
    key = jax.random.PRNGKey(0)
    k_x, k_i = jax.random.split(key)

    # Shapes from the module annotation: input [4, 5, 6] float32,
    # indices [-1] (dynamic length) integer — use N=3 here (padded to 8 inside).
    x = jax.random.normal(k_x, (4, 5, 6), dtype=jnp.float32)
    indices = jax.random.randint(k_i, (3,), minval=0, maxval=5, dtype=jnp.int32)

    out = jax.block_until_ready(index_select_dim1(x, indices))

    # Reference check against plain JAX gather along axis 1 (expected bit-exact;
    # tiny atol only guards against sub-ulp differences in the f32 MXU passes).
    ref = jnp.take(x, indices, axis=1)
    assert out.shape == (4, indices.shape[0], 6)
    assert jnp.allclose(out, ref, rtol=0.0, atol=1e-6)

    # Empty-indices path (handled in the wrapper, no kernel call).
    out_empty = jax.block_until_ready(index_select_dim1(x, jnp.zeros((0,), jnp.int32)))
    assert out_empty.shape == (4, 0, 6)

    print("KERNEL_OK")
</pallas_src>

<mosaic_0001>
module attributes {stable_mosaic.version = 11 : i64} {
  func.func @_index_select_kernel(%arg0: memref<8x1xi32, #tpu.memory_space<vmem>>, %arg1: memref<4x5x6xf32, #tpu.memory_space<vmem>>, %arg2: memref<4x8x6xf32, #tpu.memory_space<vmem>>) attributes {dimension_semantics = [], scalar_prefetch = 0 : i64, scratch_operands = 0 : i64, tpu.core_type = #tpu.core_type<tc>} {
    %c0 = arith.constant 0 : index
    %c0_0 = arith.constant 0 : index
    %0 = vector.load %arg0[%c0, %c0_0] : memref<8x1xi32, #tpu.memory_space<vmem>>, vector<8x1xi32>
    %c0_i32 = arith.constant 0 : i32
    %c4_i32 = arith.constant 4 : i32
    %1 = vector.broadcast %c0_i32 : i32 to vector<8x1xi32>
    %2 = arith.maxsi %1, %0 : vector<8x1xi32>
    %3 = vector.broadcast %c4_i32 : i32 to vector<8x1xi32>
    %4 = arith.minsi %3, %2 : vector<8x1xi32>
    %5 = tpu.iota {dimensions = array<i32: 1>} : vector<8x5xi32>
    %6 = vector.broadcast %4 : vector<8x1xi32> to vector<8x5xi32>
    %7 = arith.cmpi eq, %6, %5 : vector<8x5xi32>
    %8 = arith.extui %7 : vector<8x5xi1> to vector<8x5xi32>
    %9 = arith.sitofp %8 : vector<8x5xi32> to vector<8x5xf32>
    %10 = vector.shape_cast %9 : vector<8x5xf32> to vector<1x8x5xf32>
    %11 = vector.shape_cast %10 : vector<1x8x5xf32> to vector<1x8x5xf32>
    %12 = vector.broadcast %11 : vector<1x8x5xf32> to vector<4x8x5xf32>
    %c0_1 = arith.constant 0 : index
    %c0_2 = arith.constant 0 : index
    %c0_3 = arith.constant 0 : index
    %13 = vector.load %arg1[%c0_1, %c0_2, %c0_3] : memref<4x5x6xf32, #tpu.memory_space<vmem>>, vector<4x5x6xf32>
    %cst = arith.constant dense<0.000000e+00> : vector<4x8x6xf32>
    %14 = tpu.matmul %12, %13, %cst {dimension_numbers = #tpu.dot_dimension_numbers<[2], [1], [1], [2], [0, 0, 0, 1, 1, 2], [0], [0]>, precision = #tpu.contract_precision<fp32>} : vector<4x8x5xf32>, vector<4x5x6xf32>, vector<4x8x6xf32> -> vector<4x8x6xf32>
    %c0_4 = arith.constant 0 : index
    %c0_5 = arith.constant 0 : index
    %c0_6 = arith.constant 0 : index
    %15 = vector.load %arg2[%c0_4, %c0_5, %c0_6] : memref<4x8x6xf32, #tpu.memory_space<vmem>>, vector<4x8x6xf32>
    tpu.vector_store %arg2[%c0_4, %c0_5, %c0_6], %14 {strides = array<i32>} : memref<4x8x6xf32, #tpu.memory_space<vmem>>, vector<4x8x6xf32>,
    return
  }
}

</mosaic_0001>

<bundles_post_ra>
// kernel: tpu_custom_call.1
= control target key start
LH: loop header
LB: loop body
LE: loop exit
PB: predicated region body
PF: predicated region fallthrough
CT: control target
= control target key end

     0   :  { %v2063_v0 = vmov 0   ;;  %v2064_v2 = vmov 0.0   ;;  %vm32_vm2 = vcmask 1044480   ;;  %vm2065_vm3 = vmmov 0   ;;  %s2252_s0 = inlined_call_operand.vmem [shape: s32[8,1], index: 0, kind: input, shape index: {}]   ;;  %s2253_s1 = inlined_call_operand.vmem [shape: f32[4,5,6], index: 1, kind: input, shape index: {}]   ;;  %s2254_s2 = inlined_call_operand.vmem [shape: f32[4,8,6], index: 2, kind: output, shape index: {}]  }
   0x1   :  { %2062 = vset.pattern.permute.xlu0 %v2063_v0  ;;  %v11_v1 = vld [vmem:[%s2252_s0] sm:$0xff]  ;;  %1899 = vmatprep.subr.mxu0 %v2064_v2  ;;  %v25_v6 = vld [vmem:[%s2253_s1 + $0x8] sm:$0x1f]  ;;  %v26_v11 = vld [vmem:[%s2253_s1 + $0x10] sm:$0x1f]  ;;  %v16_v15 = vlaneseq  ;;  %vm28_vm4 = vcmask 39936  }
   0x2   :  { %vm12_vm0 = vcmp.gt.s32.totalorder %v11_v1, 0  ;;  %1929 = vmatprep.subr.mxu1 %v2064_v2  ;;  %v24_v5 = vld [vmem:[%s2253_s1] sm:$0x1f]  ;;  %1901 = vmatprep.mubr.msk.f32.mxu0 %vm2065_vm3, %v2064_v2  ;;  %v483_v8 = vsel %vm32_vm2, %v25_v6, 0  ;;  %v27_v12 = vld [vmem:[%s2253_s1 + $0x18] sm:$0x1f] }
   0x3   :  { %v13_v3 = vsel %vm12_vm0, %v11_v1, 0  ;;  %1931 = vmatprep.mubr.msk.f32.mxu1 %vm2065_vm3, %v2064_v2  ;;  %v34_v7 = vsel %vm32_vm2, %v24_v5, 0  ;;  %v2100_v10 = vand.u32 4294901760, %v483_v8  ;;  %v932_v13 = vsel %vm32_vm2, %v26_v11, 0 }
   0x4   :  { %vm14_vm1 = vcmp.lt.s32.totalorder %v13_v3, 4  ;;  %v2098_v9 = vand.u32 4294901760, %v34_v7  ;;  %v1381_v14 = vsel %vm32_vm2, %v27_v12, 0  ;;  %v17_v16 = vand.u32 127, %v16_v15 }
   0x5   :  { %v15_v4 = vsel %vm14_vm1, %v13_v3, 4  ;;  %1930 = vmatpush3.msra.mxu1 %v2100_v10  ;;  %v563_v18 = vsub.f32 %v483_v8, %v2100_v10  ;;  %v2156_v32 = vand.u32 4294901760, %v932_v13  ;;  %v2158_v33 = vand.u32 4294901760, %v1381_v14 }
   0x6   :  { %19 = vperm.xlu0 %2062, %v15_v4   ;;  %1900 = vmatpush3.msra.mxu0 %v2098_v9  ;;  %v114_v17 = vsub.f32 %v34_v7, %v2098_v9  ;;  %vm1829_vm6 = vcmask 48128  }
   0x7   :  { %1904 = vmatprep.subr.mxu0 %v2064_v2  ;;  %1934 = vmatprep.subr.mxu1 %v2064_v2  ;;  %v564_v21 = vand.u32 4294901760, %v563_v18  ;;  %v1012_v34 = vsub.f32 %v932_v13, %v2156_v32  ;;  %v1461_v35 = vsub.f32 %v1381_v14, %v2158_v33 }
   0x8   :  { %v115_v20 = vand.u32 4294901760, %v114_v17 }
   0x9   :  { %v565_v26 = vsub.f32 %v563_v18, %v564_v21  ;;  %v1013_v36 = vand.u32 4294901760, %v1012_v34  ;;  %v1462_v37 = vand.u32 4294901760, %v1461_v35 }
   0xa   :  { %v116_v25 = vsub.f32 %v114_v17, %v115_v20 }
   0xb   :  { %v566_v30 = vand.u32 4294901760, %v565_v26  ;;  %v1014_v38 = vsub.f32 %v1012_v34, %v1013_v36  ;;  %v1463_v39 = vsub.f32 %v1461_v35, %v1462_v37 }
   0xc   :  { %v117_v29 = vand.u32 4294901760, %v116_v25 }
   0xd   :  { %v1015_v40 = vand.u32 4294901760, %v1014_v38  ;;  %v1464_v41 = vand.u32 4294901760, %v1463_v39 }
  0x85   :  { %v20_v19 = vpop.permute.xlu0 %19 }
  0x86   :  { %vm21_vm5 = vcmp.eq.s32.totalorder %v20_v19, %v17_v16 }
  0x87   :  { %v2117_v22 = vsel %vm21_vm5, 1.0, %v2064_v2 }
  0x88   :  { %v30_v23 = vsel %vm28_vm4, %v2117_v22, 0 }
  0x89   :  { %v2121_v24 = vsub.f32 %v30_v23, %v30_v23 }
  0x8b   :  { %v2124_v27 = vand.u32 4294901760, %v2121_v24 }
  0x8d   :  { %v105_v28 = vsub.f32 %v2121_v24, %v2124_v27 }
  0x8f   :  { %v106_v31 = vand.u32 4294901760, %v105_v28 }
  0x91   :  { %1902 = vmatmul.mubr.f32.vlgmr.msra.gmra.mrb[0].mxu0 %v106_v31  ;;  %1932 = vmatmul.mubr.f32.vlgmr.msra.gmra.mrb[0].mxu1 %v106_v31 }
  0x92   :  { %1905 = vmatpush3.msra.mxu0 %v117_v29  ;;  %1935 = vmatpush3.msra.mxu1 %v566_v30 }
  0x93   :  { %1906 = vmatprep.mubr.msk.f32.mxu0 %vm2065_vm3, %v2064_v2  ;;  %1909 = vmatprep.subr.mxu0 %v2064_v2 }
  0x94   :  { %1936 = vmatprep.mubr.msk.f32.mxu1 %vm2065_vm3, %v2064_v2  ;;  %1939 = vmatprep.subr.mxu1 %v2064_v2 }
  0x99   :  { %1907 = vmatmul.mubr.msk.f32.vlgmr.msra.gmra.mrb[0].mxu0 %vm28_vm4, %v2117_v22  ;;  %1937 = vmatmul.mubr.msk.f32.vlgmr.msra.gmra.mrb[0].mxu1 %vm28_vm4, %v2117_v22 }
  0x9a   :  { %1910 = vmatpush3.msra.mxu0 %v114_v17  ;;  %1940 = vmatpush3.msra.mxu1 %v563_v18 }
  0x9b   :  { %1911 = vmatprep.mubr.msk.f32.mxu0 %vm2065_vm3, %v2064_v2  ;;  %1914 = vmatprep.subr.mxu0 %v2064_v2 }
  0x9c   :  { %1941 = vmatprep.mubr.msk.f32.mxu1 %vm2065_vm3, %v2064_v2  ;;  %1944 = vmatprep.subr.mxu1 %v2064_v2 }
  0xa1   :  { %1912 = vmatmul.mubr.f32.vlgmr.msra.gmra.mrb[0].mxu0 %v2121_v24  ;;  %1942 = vmatmul.mubr.f32.vlgmr.msra.gmra.mrb[0].mxu1 %v2121_v24 }
  0xa2   :  { %1915 = vmatpush3.msra.mxu0 %v2098_v9  ;;  %1945 = vmatpush3.msra.mxu1 %v2100_v10 }
  0xa3   :  { %1916 = vmatprep.mubr.msk.f32.mxu0 %vm2065_vm3, %v2064_v2  ;;  %1919 = vmatprep.subr.mxu0 %v2064_v2 }
  0xa4   :  { %1946 = vmatprep.mubr.msk.f32.mxu1 %vm2065_vm3, %v2064_v2  ;;  %1949 = vmatprep.subr.mxu1 %v2064_v2 }
  0xa9   :  { %1917 = vmatmul.mubr.f32.vlgmr.msra.gmra.mrb[0].mxu0 %v2124_v27  ;;  %1947 = vmatmul.mubr.f32.vlgmr.msra.gmra.mrb[0].mxu1 %v2124_v27 }
  0xaa   :  { %1920 = vmatpush3.msra.mxu0 %v115_v20  ;;  %1950 = vmatpush3.msra.mxu1 %v564_v21 }
  0xab   :  { %1921 = vmatprep.mubr.msk.f32.mxu0 %vm2065_vm3, %v2064_v2  ;;  %1924 = vmatprep.subr.mxu0 %v2064_v2 }
  0xac   :  { %1951 = vmatprep.mubr.msk.f32.mxu1 %vm2065_vm3, %v2064_v2  ;;  %1954 = vmatprep.subr.mxu1 %v2064_v2 }
  0xb1   :  { %1922 = vmatmul.mubr.msk.f32.vlgmr.msra.gmra.mrb[0].mxu0 %vm28_vm4, %v2117_v22  ;;  %1952 = vmatmul.mubr.msk.f32.vlgmr.msra.gmra.mrb[0].mxu1 %vm28_vm4, %v2117_v22 }
  0xb2   :  { %1925 = vmatpush3.msra.mxu0 %v2098_v9  ;;  %1955 = vmatpush3.msra.mxu1 %v2100_v10 }
  0xb3   :  { %1926 = vmatprep.mubr.msk.f32.mxu0 %vm2065_vm3, %v2064_v2  ;;  %1956 = vmatprep.mubr.msk.f32.mxu1 %vm2065_vm3, %v2064_v2 }
  0xb4   :  { %1959 = vmatprep.subr.mxu0 %v2064_v2  ;;  %1989 = vmatprep.subr.mxu1 %v2064_v2 }
  0xb9   :  { %1927 = vmatmul.mubr.msk.f32.vlgmr.msra.gmra.mrb[0].mxu0 %vm28_vm4, %v2117_v22  ;;  %1957 = vmatmul.mubr.msk.f32.vlgmr.msra.gmra.mrb[0].mxu1 %vm28_vm4, %v2117_v22 }
  0xba   :  { %1960 = vmatpush3.msra.mxu0 %v2156_v32  ;;  %1990 = vmatpush3.msra.mxu1 %v2158_v33 }
  0xbb   :  { %1961 = vmatprep.mubr.msk.f32.mxu0 %vm2065_vm3, %v2064_v2  ;;  %1964 = vmatprep.subr.mxu0 %v2064_v2 }
  0xbc   :  { %1991 = vmatprep.mubr.msk.f32.mxu1 %vm2065_vm3, %v2064_v2  ;;  %1994 = vmatprep.subr.mxu1 %v2064_v2 }
  0xbd   :  { %1962 = vmatmul.mubr.f32.vlgmr.msra.gmra.mrb[2].mxu0 %v106_v31  ;;  %1992 = vmatmul.mubr.f32.vlgmr.msra.gmra.mrb[2].mxu1 %v106_v31 }
  0xbe   :  { %1965 = vmatpush3.msra.mxu0 %v1015_v40  ;;  %1995 = vmatpush3.msra.mxu1 %v1464_v41 }
  0xbf   :  { %1966 = vmatprep.mubr.msk.f32.mxu0 %vm2065_vm3, %v2064_v2  ;;  %1969 = vmatprep.subr.mxu0 %v2064_v2 }
  0xc0   :  { %1996 = vmatprep.mubr.msk.f32.mxu1 %vm2065_vm3, %v2064_v2  ;;  %1999 = vmatprep.subr.mxu1 %v2064_v2 }
  0xc5   :  { %1967 = vmatmul.mubr.msk.f32.vlgmr.msra.gmra.mrb[2].mxu0 %vm28_vm4, %v2117_v22  ;;  %1997 = vmatmul.mubr.msk.f32.vlgmr.msra.gmra.mrb[2].mxu1 %vm28_vm4, %v2117_v22 }
  0xc6   :  { %1970 = vmatpush3.msra.mxu0 %v1012_v34  ;;  %2000 = vmatpush3.msra.mxu1 %v1461_v35 }
  0xc7   :  { %1971 = vmatprep.mubr.msk.f32.mxu0 %vm2065_vm3, %v2064_v2  ;;  %1974 = vmatprep.subr.mxu0 %v2064_v2 }
  0xc8   :  { %2001 = vmatprep.mubr.msk.f32.mxu1 %vm2065_vm3, %v2064_v2  ;;  %2004 = vmatprep.subr.mxu1 %v2064_v2 }
  0xcd   :  { %1972 = vmatmul.mubr.f32.vlgmr.msra.gmra.mrb[2].mxu0 %v2121_v24  ;;  %2002 = vmatmul.mubr.f32.vlgmr.msra.gmra.mrb[2].mxu1 %v2121_v24 }
  0xce   :  { %1975 = vmatpush3.msra.mxu0 %v2156_v32  ;;  %2005 = vmatpush3.msra.mxu1 %v2158_v33 }
  0xcf   :  { %1976 = vmatprep.mubr.msk.f32.mxu0 %vm2065_vm3, %v2064_v2  ;;  %1979 = vmatprep.subr.mxu0 %v2064_v2 }
  0xd0   :  { %2006 = vmatprep.mubr.msk.f32.mxu1 %vm2065_vm3, %v2064_v2  ;;  %2009 = vmatprep.subr.mxu1 %v2064_v2 }
  0xd5   :  { %1977 = vmatmul.mubr.f32.vlgmr.msra.gmra.mrb[2].mxu0 %v2124_v27  ;;  %2007 = vmatmul.mubr.f32.vlgmr.msra.gmra.mrb[2].mxu1 %v2124_v27 }
  0xd6   :  { %1980 = vmatpush3.msra.mxu0 %v1013_v36  ;;  %2010 = vmatpush3.msra.mxu1 %v1462_v37 }
  0xd7   :  { %1981 = vmatprep.mubr.msk.f32.mxu0 %vm2065_vm3, %v2064_v2  ;;  %1984 = vmatprep.subr.mxu0 %v2064_v2 }
  0xd8   :  { %2011 = vmatprep.mubr.msk.f32.mxu1 %vm2065_vm3, %v2064_v2  ;;  %2014 = vmatprep.subr.mxu1 %v2064_v2 }
  0xdd   :  { %1982 = vmatmul.mubr.msk.f32.vlgmr.msra.gmra.mrb[2].mxu0 %vm28_vm4, %v2117_v22  ;;  %2012 = vmatmul.mubr.msk.f32.vlgmr.msra.gmra.mrb[2].mxu1 %vm28_vm4, %v2117_v22 }
  0xde   :  { %1985 = vmatpush3.msra.mxu0 %v2156_v32  ;;  %2015 = vmatpush3.msra.mxu1 %v2158_v33 }
  0xdf   :  { %1986 = vmatprep.mubr.msk.f32.mxu0 %vm2065_vm3, %v2064_v2  ;;  %2016 = vmatprep.mubr.msk.f32.mxu1 %vm2065_vm3, %v2064_v2 }
  0xe5   :  { %1987 = vmatmul.mubr.msk.f32.vlgmr.msra.gmra.mrb[2].mxu0 %vm28_vm4, %v2117_v22  ;;  %2017 = vmatmul.mubr.msk.f32.vlgmr.msra.gmra.mrb[2].mxu1 %vm28_vm4, %v2117_v22 }
 0x18c   :  { %v478_v42 = vpop.f32.mrb[0].mxu0  ;;  %v927_v43 = vpop.f32.mrb[0].mxu1 }
 0x18d   :  { %1830 = vst.msk [vmem:[%s2254_s2] sm:$0xff] %vm1829_vm6, %v478_v42  ;;  %1831 = vst.msk [vmem:[%s2254_s2 + $0x8] sm:$0xff] %vm1829_vm6, %v927_v43  ;;  %v1928_v44 = vpop.f32.mrb[1].mxu0  ;;  %v1958_v45 = vpop.f32.mrb[1].mxu1 }
 0x1b8   :  { %v1376_v46 = vpop.f32.mrb[2].mxu0  ;;  %v1825_v47 = vpop.f32.mrb[2].mxu1 }
 0x1b9   :  { %1832 = vst.msk [vmem:[%s2254_s2 + $0x10] sm:$0xff] %vm1829_vm6, %v1376_v46  ;;  %1833 = vst.msk [vmem:[%s2254_s2 + $0x18] sm:$0xff] %vm1829_vm6, %v1825_v47  ;;  %v1988_v48 = vpop.f32.mrb[3].mxu0  ;;  %v2018_v49 = vpop.f32.mrb[3].mxu1 }

</bundles_post_ra>
